<compile_context>
chip_gen: v6e
topology: v6e:2x2x1
jax: 0.10.0
libtpu: 0.0.40
codegen_flags: <defaults>
</compile_context>

<pallas_src>
import functools

import jax
import jax.numpy as jnp
from jax import lax
from jax.experimental import pallas as pl
from jax.experimental.pallas import tpu as pltpu

_EPS = 1e-8                       # torch cosine_similarity default eps
_C_CHUNK = 256                    # sublane slab for the channel reduction
_LANE_CAP = 2048
_TARGET_BLOCK_BYTES = 2 * 1024 * 1024


def _round_up(x, m):
    return (x + m - 1) // m * m


def _pick_lane(hw_pad, c, itemsize):
    """Largest multiple of 128 that divides hw_pad, ~2 MiB/block, capped at 2048."""
    target = _TARGET_BLOCK_BYTES // max(1, c * itemsize)
    target = max(128, min(_LANE_CAP, (target // 128) * 128))
    lane = min(hw_pad, target)
    lane -= lane % 128
    lane = max(lane, 128)
    while hw_pad % lane != 0:     # terminates: 128 always divides hw_pad
        lane -= 128
    return lane


def _tile_cosine_dist(a_ref, b_ref):
    """Cosine distance over channels for one (1, C, LANE) tile -> (1, LANE) f32."""
    C = a_ref.shape[1]
    lane = a_ref.shape[2]
    dot = jnp.zeros((1, lane), jnp.float32)
    saa = jnp.zeros((1, lane), jnp.float32)
    sbb = jnp.zeros((1, lane), jnp.float32)
    # Chunk the channel reduction so only one slab of elementwise products is live.
    for c0 in range(0, C, _C_CHUNK):
        cs = min(_C_CHUNK, C - c0)
        a = a_ref[0, c0:c0 + cs, :].astype(jnp.float32)
        b = b_ref[0, c0:c0 + cs, :].astype(jnp.float32)
        dot = dot + jnp.sum(a * b, axis=0, keepdims=True)
        saa = saa + jnp.sum(a * a, axis=0, keepdims=True)
        sbb = sbb + jnp.sum(b * b, axis=0, keepdims=True)
    # One EUP rsqrt instead of two sqrt + div; exactly matches torch's eps clamp.
    denom_sq = jnp.maximum(saa, _EPS * _EPS) * jnp.maximum(sbb, _EPS * _EPS)
    cos = dot * lax.rsqrt(denom_sq)
    return 1.0 - cos


def _dist_map_kernel(a_ref, b_ref, map_ref):
    # (1, LANE) lane-dense store; padded columns are cropped in the wrapper.
    map_ref[...] = _tile_cosine_dist(a_ref, b_ref)


def _dist_psum_kernel(a_ref, b_ref, psum_ref, *, hw):
    lane = a_ref.shape[2]
    dist = _tile_cosine_dist(a_ref, b_ref)                        # (1, LANE)
    # Mask out zero-padded spatial columns so they don't dilute the mean.
    col = pl.program_id(1) * lane + lax.broadcasted_iota(jnp.int32, (1, lane), 1)
    dist = jnp.where(col < hw, dist, 0.0)
    # Fold LANE lanes down to 128 partial sums; final reduce happens in XLA.
    psum_ref[...] = jnp.sum(dist.reshape(1, lane // 128, 128), axis=1,
                            keepdims=True)


def cosine_distance_metric(actual, predicted, reduce=True):
    """Pallas TPU CosineDistanceMetric.forward.

    actual, predicted: (B, C, H, W) arrays (NCHW). Returns the scalar mean
    cosine distance if reduce=True, otherwise the (B, H, W) distance map.
    """
    B, C, H, W = actual.shape
    HW = H * W
    hw_pad = _round_up(HW, 128)
    lane = _pick_lane(hw_pad, C, jnp.dtype(actual.dtype).itemsize)
    num_tiles = hw_pad // lane

    a = actual.reshape(B, C, HW)
    b = predicted.reshape(B, C, HW)
    if hw_pad != HW:
        pad = ((0, 0), (0, 0), (0, hw_pad - HW))
        a = jnp.pad(a, pad)
        b = jnp.pad(b, pad)

    grid = (B, num_tiles)
    in_specs = [
        pl.BlockSpec((1, C, lane), lambda bi, j: (bi, 0, j)),
        pl.BlockSpec((1, C, lane), lambda bi, j: (bi, 0, j)),
    ]
    cparams = pltpu.CompilerParams(
        dimension_semantics=("parallel", "parallel"),
        vmem_limit_bytes=64 * 1024 * 1024,
    )

    if reduce:
        # Partial sums only -- no full dist-map writeback on the reduce path.
        psum = pl.pallas_call(
            functools.partial(_dist_psum_kernel, hw=HW),
            out_shape=jax.ShapeDtypeStruct((B, num_tiles, 128), jnp.float32),
            grid=grid,
            in_specs=in_specs,
            out_specs=pl.BlockSpec((1, 1, 128), lambda bi, j: (bi, j, 0)),
            compiler_params=cparams,
        )(a, b)
        return jnp.sum(psum) / (B * HW)

    dist_map = pl.pallas_call(
        _dist_map_kernel,
        out_shape=jax.ShapeDtypeStruct((B, hw_pad), jnp.float32),
        grid=grid,
        in_specs=in_specs,
        out_specs=pl.BlockSpec((1, lane), lambda bi, j: (bi, j)),
        compiler_params=cparams,
    )(a, b)
    return dist_map[:, :HW].reshape(B, H, W)


def _reference(actual, predicted):
    dot = jnp.sum(actual * predicted, axis=1)
    na = jnp.sqrt(jnp.sum(actual * actual, axis=1))
    nb = jnp.sqrt(jnp.sum(predicted * predicted, axis=1))
    return 1.0 - dot / (jnp.maximum(na, _EPS) * jnp.maximum(nb, _EPS))


if __name__ == "__main__":
    key = jax.random.PRNGKey(0)

    # Case 1: HW already a multiple of 128.
    k1, k2, key = jax.random.split(key, 3)
    B, C, H, W = 2, 4, 16, 16
    actual = jax.random.normal(k1, (B, C, H, W), dtype=jnp.float32)
    predicted = jax.random.normal(k2, (B, C, H, W), dtype=jnp.float32)

    out_reduced = jax.block_until_ready(
        cosine_distance_metric(actual, predicted, reduce=True))
    out_map = jax.block_until_ready(
        cosine_distance_metric(actual, predicted, reduce=False))

    ref_map = _reference(actual, predicted)
    assert jnp.allclose(out_map, ref_map, atol=1e-5), "distance map mismatch"
    assert jnp.allclose(out_reduced, ref_map.mean(), atol=1e-5), "mean mismatch"

    # Case 2: ragged HW (exercises padding + mean masking).
    k3, k4, key = jax.random.split(key, 3)
    B2, C2, H2, W2 = 2, 6, 10, 10
    actual2 = jax.random.normal(k3, (B2, C2, H2, W2), dtype=jnp.float32)
    predicted2 = jax.random.normal(k4, (B2, C2, H2, W2), dtype=jnp.float32)

    out_reduced2 = jax.block_until_ready(
        cosine_distance_metric(actual2, predicted2, reduce=True))
    out_map2 = jax.block_until_ready(
        cosine_distance_metric(actual2, predicted2, reduce=False))

    ref_map2 = _reference(actual2, predicted2)
    assert jnp.allclose(out_map2, ref_map2, atol=1e-5), "padded map mismatch"
    assert jnp.allclose(out_reduced2, ref_map2.mean(), atol=1e-5), "padded mean mismatch"

    print("KERNEL_OK")
</pallas_src>

<mosaic_0001>
module attributes {stable_mosaic.version = 11 : i64} {
  func.func @_dist_psum_kernel(%arg0: i32, %arg1: i32, %arg2: memref<1x4x256xf32, #tpu.memory_space<vmem>>, %arg3: memref<1x4x256xf32, #tpu.memory_space<vmem>>, %arg4: memref<1x1x128xf32, #tpu.memory_space<vmem>>) attributes {dimension_semantics = [#tpu.dimension_semantics<parallel>, #tpu.dimension_semantics<parallel>], iteration_bounds = array<i64: 2, 1>, scalar_prefetch = 0 : i64, scratch_operands = 0 : i64, tpu.core_type = #tpu.core_type<tc>, window_params = [{transform_indices = @transform_0, window_bounds = array<i64: 1, 4, 256>}, {transform_indices = @transform_1, window_bounds = array<i64: 1, 4, 256>}, {transform_indices = @transform_2, window_bounds = array<i64: 1, 1, 128>}]} {
    %cst = arith.constant 0.000000e+00 : f32
    %0 = vector.broadcast %cst : f32 to vector<1x256xf32>
    %cst_0 = arith.constant 0.000000e+00 : f32
    %1 = vector.broadcast %cst_0 : f32 to vector<1x256xf32>
    %cst_1 = arith.constant 0.000000e+00 : f32
    %2 = vector.broadcast %cst_1 : f32 to vector<1x256xf32>
    %c0 = arith.constant 0 : index
    %c0_2 = arith.constant 0 : index
    %c0_3 = arith.constant 0 : index
    %3 = vector.load %arg2[%c0, %c0_2, %c0_3] : memref<1x4x256xf32, #tpu.memory_space<vmem>>, vector<1x4x256xf32>
    %4 = vector.shape_cast %3 : vector<1x4x256xf32> to vector<4x256xf32>
    %c0_4 = arith.constant 0 : index
    %c0_5 = arith.constant 0 : index
    %c0_6 = arith.constant 0 : index
    %5 = vector.load %arg3[%c0_4, %c0_5, %c0_6] : memref<1x4x256xf32, #tpu.memory_space<vmem>>, vector<1x4x256xf32>
    %6 = vector.shape_cast %5 : vector<1x4x256xf32> to vector<4x256xf32>
    %7 = arith.mulf %4, %6 : vector<4x256xf32>
    %cst_7 = arith.constant dense<0.000000e+00> : vector<256xf32>
    %8 = vector.multi_reduction <add>, %7, %cst_7 [0] : vector<4x256xf32> to vector<256xf32>
    %9 = vector.shape_cast %8 : vector<256xf32> to vector<1x256xf32>
    %10 = arith.addf %0, %9 : vector<1x256xf32>
    %11 = arith.mulf %4, %4 : vector<4x256xf32>
    %cst_8 = arith.constant dense<0.000000e+00> : vector<256xf32>
    %12 = vector.multi_reduction <add>, %11, %cst_8 [0] : vector<4x256xf32> to vector<256xf32>
    %13 = vector.shape_cast %12 : vector<256xf32> to vector<1x256xf32>
    %14 = arith.addf %1, %13 : vector<1x256xf32>
    %15 = arith.mulf %6, %6 : vector<4x256xf32>
    %cst_9 = arith.constant dense<0.000000e+00> : vector<256xf32>
    %16 = vector.multi_reduction <add>, %15, %cst_9 [0] : vector<4x256xf32> to vector<256xf32>
    %17 = vector.shape_cast %16 : vector<256xf32> to vector<1x256xf32>
    %18 = arith.addf %2, %17 : vector<1x256xf32>
    %cst_10 = arith.constant 1.000000e-16 : f32
    %19 = vector.broadcast %cst_10 : f32 to vector<1x256xf32>
    %20 = arith.maximumf %14, %19 : vector<1x256xf32>
    %cst_11 = arith.constant 1.000000e-16 : f32
    %21 = vector.broadcast %cst_11 : f32 to vector<1x256xf32>
    %22 = arith.maximumf %18, %21 : vector<1x256xf32>
    %23 = arith.mulf %20, %22 : vector<1x256xf32>
    %24 = math.rsqrt %23 : vector<1x256xf32>
    %25 = arith.mulf %10, %24 : vector<1x256xf32>
    %cst_12 = arith.constant 1.000000e+00 : f32
    %26 = vector.broadcast %cst_12 : f32 to vector<1x256xf32>
    %27 = arith.subf %26, %25 : vector<1x256xf32>
    %c256_i32 = arith.constant 256 : i32
    %28 = arith.muli %arg1, %c256_i32 : i32
    %29 = tpu.iota {dimensions = array<i32: 1>} : vector<1x256xi32>
    %30 = vector.broadcast %28 : i32 to vector<1x256xi32>
    %31 = arith.addi %30, %29 : vector<1x256xi32>
    %c256_i32_13 = arith.constant 256 : i32
    %32 = vector.broadcast %c256_i32_13 : i32 to vector<1x256xi32>
    %33 = arith.cmpi slt, %31, %32 : vector<1x256xi32>
    %cst_14 = arith.constant 0.000000e+00 : f32
    %34 = vector.broadcast %cst_14 : f32 to vector<1x256xf32>
    %35 = arith.select %33, %27, %34 : vector<1x256xi1>, vector<1x256xf32>
    %36 = vector.shape_cast %35 : vector<1x256xf32> to vector<1x2x128xf32>
    %cst_15 = arith.constant dense<0.000000e+00> : vector<1x128xf32>
    %37 = vector.multi_reduction <add>, %36, %cst_15 [1] : vector<1x2x128xf32> to vector<1x128xf32>
    %38 = vector.shape_cast %37 : vector<1x128xf32> to vector<1x1x128xf32>
    %c0_16 = arith.constant 0 : index
    %c0_17 = arith.constant 0 : index
    %c0_18 = arith.constant 0 : index
    %39 = vector.load %arg4[%c0_16, %c0_17, %c0_18] : memref<1x1x128xf32, #tpu.memory_space<vmem>>, vector<1x1x128xf32>
    tpu.vector_store %arg4[%c0_16, %c0_17, %c0_18], %38 {strides = array<i32>} : memref<1x1x128xf32, #tpu.memory_space<vmem>>, vector<1x1x128xf32>,
    return
  }
  func.func @transform_0(%arg0: i32, %arg1: i32) -> (i32, i32, i32) {
    %c0_i32 = arith.constant 0 : i32
    %c0_i32_0 = arith.constant 0 : i32
    return %arg0, %c0_i32, %arg1 : i32, i32, i32
  }
  func.func @transform_1(%arg0: i32, %arg1: i32) -> (i32, i32, i32) {
    %c0_i32 = arith.constant 0 : i32
    %c0_i32_0 = arith.constant 0 : i32
    return %arg0, %c0_i32, %arg1 : i32, i32, i32
  }
  func.func @transform_2(%arg0: i32, %arg1: i32) -> (i32, i32, i32) {
    %c0_i32 = arith.constant 0 : i32
    %c0_i32_0 = arith.constant 0 : i32
    return %arg0, %arg1, %c0_i32 : i32, i32, i32
  }
}

</mosaic_0001>

<bundles_post_ra>
// kernel: tpu_custom_call.1
= control target key start
LH: loop header
LB: loop body
LE: loop exit
PB: predicated region body
PF: predicated region fallthrough
CT: control target
= control target key end

     0   :  { %7 = vsyncpa [#allocation3], 0  ;;  %s861_s0 = inlined_call_operand.hbm [shape: f32[2,4,256], index: 0, kind: input, shape index: {}]   ;;  %s862_s1 = inlined_call_operand.hbm [shape: f32[2,4,256], index: 1, kind: input, shape index: {}]   ;;  %s863_s2 = inlined_call_operand.hbm [shape: f32[2,1,128], index: 2, kind: output, shape index: {}]  }
   0x1   :  { %9 = vsyncpa [#allocation3 + $0x1], 0 }
   0x2   :  { %10 = vsyncpa [#allocation6], 0 }
   0x3   :  { %12 = vsyncpa [#allocation6 + $0x1], 0 }
   0x4   :  { %13 = vsyncpa [#allocation4], 0 }
   0x5   :  { %15 = vsyncpa [#allocation4 + $0x1], 0  ;;  %s693_s9 = smov 0   ;;  %s695_s10 = smov 0  }
   0x6   :  { %s697_s11 = smov 0   ;;  %s699_s12 = smov 0  }
   0x7   :  { %s701_s13 = smov 0   ;;  %s703_s14 = smov 0  }
   0x8 LB: > { %s442_s15 = sadd.s32 4294967295, %s672_s14   ;;  %s443_s16 = sadd.s32 4294967294, %s672_s14   ;;  %s672_s14 = sphi %s703_s14, %s21_s14   ;;  %s668_s13 = sphi %s701_s13, %s875_s13   ;;  %s664_s12 = sphi %s699_s12, %s874_s12   ;;  %s660_s11 = sphi %s697_s11, %s873_s11   ;;  %s656_s10 = sphi %s695_s10, %s872_s10   ;;  %s652_s9 = sphi %s693_s9, %s871_s9  }
   0x9   : > { %s33_s17 = sadd.s32 1, %s668_s13  ;;  %s42_s18 = sadd.s32 1, %s660_s11 }
   0xa   : > { %p35_p0 = scmp.ge.s32.totalorder %s33_s17, 2  ;;  %p49_p1 = scmp.ne.s32.totalorder %s660_s11, %s656_s10 }
   0xb   : > { %p50_p2 = scmp.eq.s32.totalorder %s672_s14, 0  ;;  %p55_p3 = scmp.ne.s32.totalorder %s656_s10, %s652_s9 }
   0xc   : > { %s877_s17 = smov (%p35_p0, %s33_s17), 0  ;;  %p56_p5 = scmp.eq.s32.totalorder %s442_s15, 0 }
   0xd   : > { %p734_p4 = por %p50_p2, %p49_p1  ;;  %s37_s20 = ssub.s32 %s668_s13, %s877_s17 }
   0xe   : > { %p109_p6 = scmp.eq.s32.totalorder %s442_s15, 1  ;;  %p40_p7 = scmp.eq.s32.totalorder %s37_s20, 0 }
   0xf   : > { %p740_p8 = por %p56_p5, %p55_p3  ;;  %p115_p10 = scmp.eq.s32.totalorder %s443_s16, 1 }
  0x10   : > { %p744_p9 = por %p109_p6, %p49_p1  ;;  %p477_p13 = scmp.lt.s32.totalorder %s672_s14, 2 }
  0x11   : > { %s749_s23 = scalar_select %p40_p7, %s660_s11, %s42_s18  }
  0x12   : > { %p751_p11 = por %p115_p10, %p55_p3  ;;  %s758_s25 = sand.u32 1, %s660_s11  }
  0x13   : > { %s446_s26 = sshll.u32 %s758_s25, 3  ;;  %s458_s27 = sshll.u32 %s668_s13, 7 }
  0x14   : > { %s147_s30 = scalar_lea.hbm %s861_s0, %s458_s27  ;;  %s139_s3 = scalar_lea.vmem [#allocation2], %s446_s26 }
  0x15   : > { %s149_s4 = sshll.u32 %s139_s3, 4  ;;  %p767_p0 = pnand %p477_p13, %p734_p4  ;;  %s150_s4 = int_to_ptr.vmem [resolvable:$true] %s149_s4 }
  0x16   : > { %p452_p1 = scmp.ge.s32.totalorder %s672_s14, 1  ;;  %p175_p2 = scmp.lt.s32.totalorder %s672_s14, 3 }
  0x17   : > { %s136_s6 = scalar_lea.sflag [#allocation3], %s758_s25  ;;  %p534_p3 = pneg %p767_p0 }
  0x18   : > { %s545_s7 = scalar_lea.vmem %s150_s4, 128  ;;  %s674_s8 = smov [#allocation2]  }
  0x19   : > { %p546_p5 = scmp.ne.s32.totalorder %s150_s4, %s545_s7  ;;  %s550_s15 = sshll.u32 %s674_s8, 4  ;;  %s551_s15 = int_to_ptr.vmem [resolvable:$false] %s550_s15 }
  0x1a   : > { %s552_s16 = scalar_lea.vmem %s551_s15, 256  ;;  %p553_p4 = scmp.lt.s32.totalorder %s150_s4, %s551_s15 }
  0x1b   : > { %p548_p6 = pnand %p546_p5, %p534_p3  ;;  %p554_p10 = scmp.lt.s32.totalorder %s552_s16, %s545_s7 }
  0x1d   : > { %p549_p7 = pneg %p548_p6  ;;  %p555_p13 = por %p554_p10, %p553_p4 }
  0x1f   : > { %p556_p12 = pnand %p555_p13, %p549_p7 }
  0x21   : > { %559 = shalt.err (!%p556_p12)
}
  0x22   : > { %469 = dma.hbm_to_vmem [thread:$0]  (!%p767_p0), %s147_s30, 128, %s150_s4, %s136_s6  }
  0x23   : > { %p785_p5 = pnand %p452_p1, %p175_p2  ;;  %s168_s28 = scalar_lea.hbm %s862_s1, %s458_s27 }
  0x24   : > { %s160_s29 = scalar_lea.vmem [#allocation5], %s446_s26  ;;  %s157_s7 = scalar_lea.sflag [#allocation6], %s758_s25 }
  0x25   : > { %s170_s3 = sshll.u32 %s160_s29, 4  ;;  %s675_s30 = smov [#allocation5]   ;;  %s171_s3 = int_to_ptr.vmem [resolvable:$true] %s170_s3 }
  0x26   : > { %s573_s8 = scalar_lea.vmem %s171_s3, 128  ;;  %s578_s4 = sshll.u32 %s675_s30, 4  ;;  %s579_s4 = int_to_ptr.vmem [resolvable:$false] %s578_s4 }
  0x27   : > { %p574_p12 = scmp.ne.s32.totalorder %s171_s3, %s573_s8  ;;  %s580_s6 = scalar_lea.vmem %s579_s4, 256 }
  0x28   : > { %p581_p1 = scmp.lt.s32.totalorder %s171_s3, %s579_s4  ;;  %p582_p2 = scmp.lt.s32.totalorder %s580_s6, %s573_s8 }
  0x29   : > { %p576_p6 = pnand %p574_p12, %p534_p3 }
  0x2a   : > { %p583_p4 = por %p582_p2, %p581_p1 }
  0x2b   : > { %p577_p7 = pneg %p576_p6 }
  0x2d   : > { %p584_p10 = pnand %p583_p4, %p577_p7 }
  0x2f   : > { %587 = shalt.err (!%p584_p10)
}
  0x30   : > { %472 = dma.hbm_to_vmem [thread:$0]  (!%p767_p0), %s168_s28, 128, %s171_s3, %s157_s7  }
  0x31   : > { %179 = sbr.rel (%p785_p5) target bundleno = 127 (0x7f), region = 28  ;;  %s801_s25 = sand.u32 (!%p785_p5), 1, %s656_s10  }
  0x32   : > { %s453_s26 = sshll.u32 (!%p785_p5), %s801_s25, 3  ;;  %s182_s27 = scalar_lea.sflag (!%p785_p5), [#allocation3], %s801_s25 }
  0x33   : > { %s185_s15 = scalar_lea.vmem (!%p785_p5), [#allocation2], %s453_s26 }
  0x36   : > { %639 = dma.done.wait (%p740_p8), %s182_s27, 128  }
  0x37   : > { %641 = vsyncadd (%p740_p8), %s182_s27, 4294967168  ;;  %s191_s5 = scalar_lea.sflag [#allocation6], %s801_s25  ;;  %s194_s16 = scalar_lea.vmem [#allocation5], %s453_s26 }
  0x38   : > { %643 = dma.done.wait (%p740_p8), %s191_s5, 128  }
  0x39   : > { %645 = vsyncadd (%p740_p8), %s191_s5, 4294967168  ;;  %v221_v0 = vld [vmem:[%s185_s15] sm:$0xff]  ;;  %v222_v1 = vld [vmem:[%s194_s16] sm:$0xff]  ;;  %vm227_vm0 = vcmask 1043456   ;;  %v676_v55 = vmov 1934713408   ;;  %v311_v57 = vlaneseq }
  0x3a   : > { %v244_v2 = vmul.f32 %v221_v0, %v221_v0  ;;  %v264_v3 = vmul.f32 %v222_v1, %v222_v1  ;;  %v223_v6 = vmul.f32 %v222_v1, %v221_v0  ;;  %v309_v56 = vunpack.c.l.s4 %v676_v55  ;;  %s218_s21 = scalar_lea.vmem [#allocation7], %s801_s25  ;;  %s455_s19 = sshll.u32 %s664_s12, 4 }
  0x3b   : > { %v312_v62 = vshrl.u32 %v311_v57, 7  ;;  %vm315_vm1 = vcmask 1041408   ;;  %s338_s18 = sshll.u32 %s218_s21, 4  ;;  %s336_s29 = scalar_lea.hbm %s863_s2, %s455_s19  ;;  %s339_s18 = int_to_ptr.vmem [resolvable:$true] %s338_s18 }
  0x3c   : > { %v246_v4 = vcombine.high %v244_v2, %v244_v2  ;;  %v248_v5 = vsel %vm227_vm0, %v244_v2, 0.0  ;;  %v266_v8 = vcombine.high %v264_v3, %v264_v3  ;;  %v268_v9 = vsel %vm227_vm0, %v264_v3, 0.0  ;;  %s325_s3 = scalar_lea.sflag [#allocation4], %s801_s25  ;;  %s588_s7 = scalar_lea.vmem %s339_s18, 16 }
  0x3d   : > { %v249_v7 = vrot.slane %v248_v5, 4  ;;  %v269_v11 = vrot.slane %v268_v9, 4  ;;  %v228_v14 = vsel %vm227_vm0, %v223_v6, 0.0  ;;  %v225_v17 = vcombine.high %v223_v6, %v223_v6  ;;  %p589_p8 = scmp.ne.s32.totalorder %s339_s18, %s588_s7  ;;  %s677_s8 = smov [#allocation7]  }
  0x3e   : > { %v255_v10 = vsel %vm227_vm0, %v246_v4, 0.0  ;;  %v275_v16 = vsel %vm227_vm0, %v266_v8, 0.0  ;;  %v229_v22 = vrot.slane %v228_v14, 4  ;;  %v310_v61 = vunpack.c.0.s8 %v309_v56  ;;  %s592_s30 = sshll.u32 %s677_s8, 4  ;;  %s593_s30 = int_to_ptr.vmem [resolvable:$false] %s592_s30 }
  0x3f   : > { %v250_v12 = vadd.f32 %v249_v7, %v248_v5  ;;  %v256_v13 = vrot.slane %v255_v10, 4  ;;  %v270_v15 = vadd.f32 %v269_v11, %v268_v9  ;;  %v276_v21 = vrot.slane %v275_v16, 4  ;;  %p590_p0 = pnand %p589_p8, %p744_p9  ;;  %s594_s4 = scalar_lea.vmem %s593_s30, 32 }
  0x40   : > { %v235_v27 = vsel %vm227_vm0, %v225_v17, 0.0  ;;  %v230_v32 = vadd.f32 %v229_v22, %v228_v14  ;;  %v313_v3 = vsub.s32 %v310_v61, %v312_v62  ;;  %p595_p13 = scmp.lt.s32.totalorder %s339_s18, %s593_s30  ;;  %p596_p5 = scmp.lt.s32.totalorder %s594_s4, %s588_s7 }
  0x41   : > { %v251_v18 = vrot.slane %v250_v12, 2  ;;  %v257_v19 = vadd.f32 %v256_v13, %v255_v10  ;;  %v271_v20 = vrot.slane %v270_v15, 2  ;;  %v277_v26 = vadd.f32 %v276_v21, %v275_v16  ;;  %p591_p3 = pneg %p590_p0 }
  0x42   : > { %v236_v35 = vrot.slane %v235_v27, 4  ;;  %v231_v42 = vrot.slane %v230_v32, 2  ;;  %p597_p12 = por %p596_p5, %p595_p13 }
  0x43   : > { %v252_v23 = vadd.f32 %v251_v18, %v250_v12  ;;  %v258_v24 = vrot.slane %v257_v19, 2  ;;  %v272_v25 = vadd.f32 %v271_v20, %v270_v15  ;;  %v278_v31 = vrot.slane %v277_v26, 2 }
  0x44   : > { %v237_v43 = vadd.f32 %v236_v35, %v235_v27  ;;  %v232_v48 = vadd.f32 %v231_v42, %v230_v32  ;;  %p598_p6 = pnand %p597_p12, %p591_p3 }
  0x45   : > { %v253_v28 = vrot.slane %v252_v23, 1  ;;  %v259_v29 = vadd.f32 %v258_v24, %v257_v19  ;;  %v273_v30 = vrot.slane %v272_v25, 1  ;;  %v279_v37 = vadd.f32 %v278_v31, %v277_v26 }
  0x46   : > { %v238_v49 = vrot.slane %v237_v43, 2  ;;  %v233_v51 = vrot.slane %v232_v48, 1 }
  0x47   : > { %v254_v33 = vadd.f32 %v253_v28, %v252_v23  ;;  %v260_v34 = vrot.slane %v259_v29, 1  ;;  %v274_v36 = vadd.f32 %v273_v30, %v272_v25  ;;  %v280_v40 = vrot.slane %v279_v37, 1 }
  0x48   : > { %v239_v52 = vadd.f32 %v238_v49, %v237_v43  ;;  %v234_v53 = vadd.f32 %v233_v51, %v232_v48 }
  0x49   : > { %v261_v38 = vadd.f32 %v260_v34, %v259_v29  ;;  %v284_v39 = vmax.f32 %v254_v33, 1e-16  ;;  %v286_v41 = vmax.f32 %v274_v36, 1e-16  ;;  %v281_v44 = vadd.f32 %v280_v40, %v279_v37 }
  0x4a   : > { %v240_v54 = vrot.slane %v239_v52, 1 }
  0x4b   : > { %v285_v45 = vmax.f32 %v261_v38, 1e-16  ;;  %v288_v46 = vmul.f32 %v286_v41, %v284_v39  ;;  %v287_v47 = vmax.f32 %v281_v44, 1e-16 }
  0x4c   : > { %v241_v59 = vadd.f32 %v240_v54, %v239_v52 }
  0x4d   : > { %528 = vrsqrt.f32 %v288_v46  ;;  %v289_v50 = vmul.f32 %v287_v47, %v285_v45 }
  0x4f   : > { %530 = vrsqrt.f32 %v289_v50 }
  0x5a   : > { %v529_v58 = vpop.eup %528 }
  0x5b   : > { %v292_v60 = vmul.f32 %v529_v58, %v234_v53 }
  0x5c   : > { %v531_v63 = vpop.eup %530 }
  0x5d   : > { %v293_v0 = vmul.f32 %v531_v63, %v241_v59  ;;  %v294_v1 = vsub.f32 1.0, %v292_v60 }
  0x5f   : > { %v295_v2 = vsub.f32 1.0, %v293_v0 }
  0x61   : > { %v307_v4 = vcombine.low %v294_v1, %v295_v2 }
  0x63   : > { %v314_v5 = vrot.slane %v307_v4, %v313_v3 }
  0x65   : > { %v316_v6 = vsel %vm315_vm1, %v314_v5, 0.0 }
  0x66   : > { %v317_v7 = vrot.slane %v316_v6, 4 }
  0x68   : > { %v318_v8 = vadd.f32 %v317_v7, %v316_v6 }
  0x6a   : > { %v319_v9 = vrot.slane %v318_v8, 2 }
  0x6c   : > { %v320_v10 = vadd.f32 %v319_v9, %v318_v8 }
  0x6e   : > { %v321_v11 = vrot.slane %v320_v10, 1 }
  0x70   : > { %v322_v12 = vadd.f32 %v321_v11, %v320_v10 }
  0x72   : > { %323 = vst [vmem:[%s218_s21] sm:$0x1] %v322_v12 }
  0x73   : > { %601 = shalt.err (!%p598_p6)
}
  0x74   : > { %s602_s12 = scalar_lea.hbm %s336_s29, 16  ;;  %s606_s26 = scalar_lea.hbm %s863_s2, 32 }
  0x75   : > { %p603_p7 = scmp.ne.s32.totalorder %s336_s29, %s602_s12  ;;  %p607_p4 = scmp.lt.s32.totalorder %s336_s29, %s863_s2 }
  0x76   : > { %p608_p10 = scmp.lt.s32.totalorder %s606_s26, %s602_s12 }
  0x77   : > { %p604_p1 = pnand %p603_p7, %p744_p9 }
  0x78   : > { %p609_p8 = por %p608_p10, %p607_p4 }
  0x79   : > { %p605_p2 = pneg %p604_p1 }
  0x7b   : > { %p610_p0 = pnand %p609_p8, %p605_p2 }
  0x7d   : > { %613 = shalt.err (!%p610_p0)
}
  0x7e   : > { %464 = dma.vmem_to_hbm [thread:$0]  (%p744_p9), %s339_s18, 16, %s336_s29, %s325_s3  }
  0x7f PF: > { %s350_s5 = sand.u32 1, %s652_s9   ;;  %p870_p3 = scmp.ge.s32.totalorder %s672_s14, 2 }
  0x80   : > { %s351_s16 = scalar_lea.sflag [#allocation4], %s350_s5 }
  0x81   : > { %p474_p13 = pnand %p870_p3, %p751_p11 }
  0x83   : > { %p475_p5 = pneg %p474_p13 }
  0x85   : > { %647 = dma.done.wait (%p475_p5), %s351_s16, 16  }
  0x86   : > { %649 = vsyncadd (%p475_p5), %s351_s16, 4294967280  ;;  %s21_s14 = sadd.s32 1, %s672_s14   ;;  %s871_s9 = smov %s656_s10 }
  0x87   : > { %p18_p12 = scmp.ge.s32.totalorder %s21_s14, 4   ;;  %s872_s10 = smov %s660_s11 }
  0x88   : > { %s873_s11 = smov %s749_s23  ;;  %s874_s12 = smov %s668_s13 }
  0x89   : > { %s875_s13 = smov %s877_s17  ;;  %20 = sbr.rel (!%p18_p12) target bundleno = 8 (0x8), region = 86 }
  0x8e   :  { %355 = vsyncpa [#allocation3], 1 }
  0x8f   :  { %357 = vsyncpa [#allocation3 + $0x1], 1 }
  0x90   :  { %358 = vsyncpa [#allocation6], 1 }
  0x91   :  { %360 = vsyncpa [#allocation6 + $0x1], 1 }
  0x92   :  { %361 = vsyncpa [#allocation4], 1 }
  0x93   :  { %363 = vsyncpa [#allocation4 + $0x1], 1 }

</bundles_post_ra>
